<compile_context>
chip_gen: v5e
topology: v5e:2x2
jax: 0.10.0
libtpu: 0.0.40
codegen_flags: <defaults>
</compile_context>

<pallas_src>
import functools

import jax
import jax.numpy as jnp
from jax.experimental import pallas as pl
from jax.experimental.pallas import tpu as pltpu

INPUT_DIM = 3
HIDDEN_DIM = 64
OUTPUT_DIM = 1
CHUNK = 256  # lanes per inner chunk; (64, 256) f32 = 16 vregs per activation


def _round_up(x, m):
    return ((x + m - 1) // m) * m


def mlp_kernel(x_ref, w1a_ref, w2_ref, b2_ref, w3_ref, b3_ref, o_ref,
               *, chunk, n_chunks):
    """Fused 3-layer MLP forward over one (4, block) transposed batch tile."""
    w1a = w1a_ref[...]          # (64, 4)  = [W1 | b1]
    w2 = w2_ref[...]            # (64, 64)
    b2 = b2_ref[...]            # (64, 1)
    w3 = w3_ref[...]            # (1, 64)
    b3 = b3_ref[0, 0]           # scalar bias from SMEM

    # Statically unrolled chunk loop: static slice starts (zero runtime index
    # math) and chunk-sized intermediates that stay within the 64-vreg file.
    for c in range(n_chunks):
        start = c * chunk
        x = x_ref[:, pl.ds(start, chunk)]                        # (4, chunk)

        # Layer 1 (+bias) on the MXU: [W1|b1] @ [x; 1].
        h1 = jnp.dot(w1a, x, preferred_element_type=jnp.float32)
        h1 = jnp.maximum(h1, 0.0)                                # (64, chunk)

        # Layer 2 on the MXU.
        h2 = jnp.dot(w2, h1, preferred_element_type=jnp.float32) + b2
        h2 = jnp.maximum(h2, 0.0)                                # (64, chunk)

        # Layer 3: (1,64)@(64,chunk) -> lane-dense (1, chunk) row.
        y = jnp.dot(w3, h2, preferred_element_type=jnp.float32) + b3
        o_ref[:, pl.ds(start, chunk)] = y.astype(o_ref.dtype)


def _choose_block(batch, block_b):
    """Per-grid-step batch tile: multiple of CHUNK, capped by padded batch,
    and kept small enough that mid/large batches yield >= 2 grid steps
    (so v7x's two TensorCores both get work under ("parallel",))."""
    desired = max(CHUNK, (block_b // CHUNK) * CHUNK)
    bp_min = _round_up(batch, CHUNK)
    block = min(desired, bp_min)
    if bp_min >= 2 * CHUNK:
        half = _round_up((bp_min + 1) // 2, CHUNK)
        block = min(block, max(CHUNK, half))
    return block


@functools.partial(jax.jit, static_argnames=("block_b",))
def mlp_controller_forward(x, w1, b1, w2, b2, w3, b3, *, block_b=2048):
    """x: (B, 3) batch-major (PyTorch layout). Weights in PyTorch (out, in)
    layout, biases as (out, 1) columns (b3 is (1, 1)). Returns (B, 1)."""
    B = x.shape[0]
    block = _choose_block(B, block_b)
    Bp = _round_up(B, block)
    grid = (Bp // block,)
    n_chunks = block // CHUNK

    # Augmented transposed input: rows 0..2 = x^T, row 3 = 1.0 (bias lane),
    # padded on the lane (batch) axis. Tiny (16 B per row of x).
    x_aug = jnp.concatenate([x, jnp.ones((B, 1), x.dtype)], axis=1).T  # (4, B)
    if Bp != B:
        x_aug = jnp.pad(x_aug, ((0, 0), (0, Bp - B)))

    # Fold b1 into W1 as an extra input column (matches the ones row above).
    w1_aug = jnp.concatenate([w1, b1], axis=1)                         # (64, 4)

    def replicated(shape):
        return pl.BlockSpec(shape, lambda i: (0, 0))

    kernel = functools.partial(mlp_kernel, chunk=CHUNK, n_chunks=n_chunks)

    out_t = pl.pallas_call(
        kernel,
        out_shape=jax.ShapeDtypeStruct((OUTPUT_DIM, Bp), x.dtype),
        grid_spec=pltpu.PrefetchScalarGridSpec(
            num_scalar_prefetch=0,
            grid=grid,
            in_specs=[
                pl.BlockSpec((INPUT_DIM + 1, block), lambda i: (0, i)),  # [x;1]
                replicated((HIDDEN_DIM, INPUT_DIM + 1)),                 # [W1|b1]
                replicated((HIDDEN_DIM, HIDDEN_DIM)),                    # W2
                replicated((HIDDEN_DIM, 1)),                             # b2
                replicated((OUTPUT_DIM, HIDDEN_DIM)),                    # W3
                pl.BlockSpec(memory_space=pltpu.MemorySpace.SMEM),       # b3
            ],
            out_specs=pl.BlockSpec((OUTPUT_DIM, block), lambda i: (0, i)),
        ),
        compiler_params=pltpu.CompilerParams(
            dimension_semantics=("parallel",),
        ),
    )(x_aug, w1_aug, w2, b2, w3, b3)

    # (1, Bp) -> (B, 1); one tiny copy over B floats.
    return out_t[:, :B].T


def init_params(key):
    """PyTorch-style Kaiming-uniform-ish init, stored in (out, in) layout."""
    ks = jax.random.split(key, 6)

    def linear_init(kw, kb, fan_in, fan_out):
        bound = 1.0 / jnp.sqrt(float(fan_in))
        w = jax.random.uniform(kw, (fan_out, fan_in), jnp.float32, -bound, bound)
        b = jax.random.uniform(kb, (fan_out, 1), jnp.float32, -bound, bound)
        return w, b

    w1, b1 = linear_init(ks[0], ks[1], INPUT_DIM, HIDDEN_DIM)
    w2, b2 = linear_init(ks[2], ks[3], HIDDEN_DIM, HIDDEN_DIM)
    w3, b3 = linear_init(ks[4], ks[5], HIDDEN_DIM, OUTPUT_DIM)
    return w1, b1, w2, b2, w3, b3


def _reference(x, params):
    w1, b1, w2, b2, w3, b3 = params
    h = jnp.maximum(x @ w1.T + b1.T, 0.0)
    h = jnp.maximum(h @ w2.T + b2.T, 0.0)
    return h @ w3.T + b3.T


if __name__ == "__main__":
    key = jax.random.PRNGKey(0)
    k_x, k_x2, k_p = jax.random.split(key, 3)
    params = init_params(k_p)

    # Small batch (single grid step, single chunk).
    batch = 16
    x = jax.random.normal(k_x, (batch, INPUT_DIM), jnp.float32)
    out = jax.block_until_ready(mlp_controller_forward(x, *params))
    ref = _reference(x, params)
    assert out.shape == (batch, OUTPUT_DIM)
    assert jnp.allclose(out, ref, atol=1e-4, rtol=1e-4)

    # Mid batch (exercises padding, 2 grid steps, multi-chunk inner loop).
    batch2 = 700
    x2 = jax.random.normal(k_x2, (batch2, INPUT_DIM), jnp.float32)
    out2 = jax.block_until_ready(mlp_controller_forward(x2, *params))
    ref2 = _reference(x2, params)
    assert out2.shape == (batch2, OUTPUT_DIM)
    assert jnp.allclose(out2, ref2, atol=1e-4, rtol=1e-4)

    print("KERNEL_OK")
</pallas_src>

<mosaic_0001>
module attributes {stable_mosaic.version = 11 : i64} {
  func.func @mlp_kernel(%arg0: i32, %arg1: memref<4x256xf32, #tpu.memory_space<vmem>>, %arg2: memref<64x4xf32, #tpu.memory_space<vmem>>, %arg3: memref<64x64xf32, #tpu.memory_space<vmem>>, %arg4: memref<64x1xf32, #tpu.memory_space<vmem>>, %arg5: memref<1x64xf32, #tpu.memory_space<vmem>>, %arg6: memref<1x1xf32, #tpu.memory_space<smem>>, %arg7: memref<1x256xf32, #tpu.memory_space<vmem>>) attributes {dimension_semantics = [#tpu.dimension_semantics<parallel>], iteration_bounds = array<i64: 1>, scalar_prefetch = 0 : i64, scratch_operands = 0 : i64, tpu.core_type = #tpu.core_type<tc>, window_params = [{transform_indices = @transform_0, window_bounds = array<i64: 4, 256>}, {pipeline_mode = #tpu.pipeline_mode<synchronous>, transform_indices = @transform_1, window_bounds = array<i64: 64, 4>}, {pipeline_mode = #tpu.pipeline_mode<synchronous>, transform_indices = @transform_2, window_bounds = array<i64: 64, 64>}, {pipeline_mode = #tpu.pipeline_mode<synchronous>, transform_indices = @transform_3, window_bounds = array<i64: 64, 1>}, {pipeline_mode = #tpu.pipeline_mode<synchronous>, transform_indices = @transform_4, window_bounds = array<i64: 1, 64>}, {transform_indices = @transform_5, window_bounds = array<i64: 1, 1>}, {transform_indices = @transform_6, window_bounds = array<i64: 1, 256>}]} {
    %c0 = arith.constant 0 : index
    %c0_0 = arith.constant 0 : index
    %0 = vector.load %arg2[%c0, %c0_0] : memref<64x4xf32, #tpu.memory_space<vmem>>, vector<64x4xf32>
    %c0_1 = arith.constant 0 : index
    %c0_2 = arith.constant 0 : index
    %1 = vector.load %arg3[%c0_1, %c0_2] : memref<64x64xf32, #tpu.memory_space<vmem>>, vector<64x64xf32>
    %c0_3 = arith.constant 0 : index
    %c0_4 = arith.constant 0 : index
    %2 = vector.load %arg4[%c0_3, %c0_4] : memref<64x1xf32, #tpu.memory_space<vmem>>, vector<64x1xf32>
    %c0_5 = arith.constant 0 : index
    %c0_6 = arith.constant 0 : index
    %3 = vector.load %arg5[%c0_5, %c0_6] : memref<1x64xf32, #tpu.memory_space<vmem>>, vector<1x64xf32>
    %c0_7 = arith.constant 0 : index
    %c0_8 = arith.constant 0 : index
    %4 = memref.load %arg6[%c0_7, %c0_8] : memref<1x1xf32, #tpu.memory_space<smem>>
    %c0_9 = arith.constant 0 : index
    %c0_10 = arith.constant 0 : index
    %5 = vector.load %arg1[%c0_9, %c0_10] : memref<4x256xf32, #tpu.memory_space<vmem>>, vector<4x256xf32>
    %cst = arith.constant dense<0.000000e+00> : vector<64x256xf32>
    %6 = tpu.matmul %0, %5, %cst {dimension_numbers = #tpu.dot_dimension_numbers<[1], [0], [0], [1], [0, 0, 1, 1], [], []>} : vector<64x4xf32>, vector<4x256xf32>, vector<64x256xf32> -> vector<64x256xf32>
    %cst_11 = arith.constant 0.000000e+00 : f32
    %7 = vector.broadcast %cst_11 : f32 to vector<64x256xf32>
    %8 = arith.maximumf %6, %7 : vector<64x256xf32>
    %cst_12 = arith.constant dense<0.000000e+00> : vector<64x256xf32>
    %9 = tpu.matmul %1, %8, %cst_12 {dimension_numbers = #tpu.dot_dimension_numbers<[1], [0], [0], [1], [0, 0, 1, 1], [], []>} : vector<64x64xf32>, vector<64x256xf32>, vector<64x256xf32> -> vector<64x256xf32>
    %10 = vector.broadcast %2 : vector<64x1xf32> to vector<64x256xf32>
    %11 = arith.addf %9, %10 : vector<64x256xf32>
    %cst_13 = arith.constant 0.000000e+00 : f32
    %12 = vector.broadcast %cst_13 : f32 to vector<64x256xf32>
    %13 = arith.maximumf %11, %12 : vector<64x256xf32>
    %cst_14 = arith.constant dense<0.000000e+00> : vector<1x256xf32>
    %14 = tpu.matmul %3, %13, %cst_14 {dimension_numbers = #tpu.dot_dimension_numbers<[1], [0], [0], [1], [0, 0, 1, 1], [], []>} : vector<1x64xf32>, vector<64x256xf32>, vector<1x256xf32> -> vector<1x256xf32>
    %15 = vector.broadcast %4 : f32 to vector<1x256xf32>
    %16 = arith.addf %14, %15 : vector<1x256xf32>
    %c0_15 = arith.constant 0 : index
    %c0_16 = arith.constant 0 : index
    %17 = vector.load %arg7[%c0_15, %c0_16] : memref<1x256xf32, #tpu.memory_space<vmem>>, vector<1x256xf32>
    tpu.vector_store %arg7[%c0_15, %c0_16], %16 {strides = array<i32>} : memref<1x256xf32, #tpu.memory_space<vmem>>, vector<1x256xf32>,
    return
  }
  func.func @transform_0(%arg0: i32) -> (i32, i32) {
    %c0_i32 = arith.constant 0 : i32
    %c0_i32_0 = arith.constant 0 : i32
    return %c0_i32, %arg0 : i32, i32
  }
  func.func @transform_1(%arg0: i32) -> (i32, i32) {
    %c0_i32 = arith.constant 0 : i32
    %c0_i32_0 = arith.constant 0 : i32
    %c0_i32_1 = arith.constant 0 : i32
    return %c0_i32, %c0_i32_0 : i32, i32
  }
  func.func @transform_2(%arg0: i32) -> (i32, i32) {
    %c0_i32 = arith.constant 0 : i32
    %c0_i32_0 = arith.constant 0 : i32
    %c0_i32_1 = arith.constant 0 : i32
    return %c0_i32, %c0_i32_0 : i32, i32
  }
  func.func @transform_3(%arg0: i32) -> (i32, i32) {
    %c0_i32 = arith.constant 0 : i32
    %c0_i32_0 = arith.constant 0 : i32
    %c0_i32_1 = arith.constant 0 : i32
    return %c0_i32, %c0_i32_0 : i32, i32
  }
  func.func @transform_4(%arg0: i32) -> (i32, i32) {
    %c0_i32 = arith.constant 0 : i32
    %c0_i32_0 = arith.constant 0 : i32
    %c0_i32_1 = arith.constant 0 : i32
    return %c0_i32, %c0_i32_0 : i32, i32
  }
  func.func @transform_5(%arg0: i32) -> (i32, i32) {
    %c0_i32 = arith.constant 0 : i32
    %c0_i32_0 = arith.constant 0 : i32
    %c0_i32_1 = arith.constant 0 : i32
    return %c0_i32, %c0_i32_0 : i32, i32
  }
  func.func @transform_6(%arg0: i32) -> (i32, i32) {
    %c0_i32 = arith.constant 0 : i32
    %c0_i32_0 = arith.constant 0 : i32
    return %c0_i32, %arg0 : i32, i32
  }
}

</mosaic_0001>

<bundles_post_ra>
// kernel: mlp_controller_forward.1
= control target key start
LH: loop header
LB: loop body
LE: loop exit
PB: predicated region body
PF: predicated region fallthrough
CT: control target
= control target key end

     0   :  { %vm80_vm0 = vcmask 1043456   ;;  %vm55_vm1 = vcmask 31744   ;;  %v445_v23 = vmov 0   ;;  %vm223_vm2 = vcmask 523264   ;;  %s605_s0 = inlined_call_operand.vmem [shape: f32[4,256], index: 0, kind: input, shape index: {}]   ;;  %s606_s1 = inlined_call_operand.vmem [shape: f32[64,4], index: 1, kind: input, shape index: {}]   ;;  %s607_s3 = inlined_call_operand.vmem [shape: f32[64,1], index: 3, kind: input, shape index: {}]   ;;  %s608_s2 = inlined_call_operand.vmem [shape: f32[64,64], index: 2, kind: input, shape index: {}]   ;;  %s609_s4 = inlined_call_operand.vmem [shape: f32[1,64], index: 4, kind: input, shape index: {}]   ;;  %s610_s5 = inlined_call_operand.<no memory space> [shape: f32[1,1], index: 5, kind: input, shape index: {}]   ;;  %s611_s6 = inlined_call_operand.vmem [shape: f32[1,256], index: 6, kind: output, shape index: {}]  }
   0x1   :  { %v50_v0 = vld [vmem:[%s605_s0] sm:$0xff]  ;;  %v25_v4 = vld [vmem:[%s606_s1 + $0x8] sm:$0xff]  ;;  %v26_v5 = vld [vmem:[%s606_s1 + $0x10] sm:$0xff]  ;;  %443 = vset.pattern.permute.xlu1 %v445_v23  ;;  %442 = vset.pattern.permute.xlu0 %v445_v23  ;;  %vm393_vm3 = vcmask 1040384  }
   0x2   :  { %52 = vst [vmem:[#allocation1] ss:$2 sm:$0xff] %v50_v0  ;;  %v24_v1 = vld [vmem:[%s606_s1] sm:$0xff]  ;;  %v27_v6 = vld [vmem:[%s606_s1 + $0x18] sm:$0xff]  ;;  %v29_v8 = vld [vmem:[%s606_s1 + $0x28] sm:$0xff]  ;;  %444 = vset.pattern.permute.xlu2 %v445_v23 }
   0x3   :  { %v28_v7 = vld [vmem:[%s606_s1 + $0x20] sm:$0xff]  ;;  %v30_v9 = vld [vmem:[%s606_s1 + $0x30] sm:$0xff]  ;;  %v31_v10 = vld [vmem:[%s606_s1 + $0x38] sm:$0xff] }
   0x4   :  { %v45_v24 = vld [vmem:[%s607_s3 + $0x28] sm:$0xff]  ;;  %v47_v27 = vld [vmem:[%s607_s3 + $0x38] sm:$0xff]  ;;  %v44_v28 = vld [vmem:[%s607_s3 + $0x20] sm:$0xff] }
   0x5   :  { %210 = vperm.xlu1 %443, %v45_v24   ;;  %220 = vperm.xlu0 %442, %v47_v27   ;;  %v46_v33 = vld [vmem:[%s607_s3 + $0x30] sm:$0xff]  ;;  %v40_v34 = vld [vmem:[%s607_s3] sm:$0xff]  ;;  %v41_v43 = vld [vmem:[%s607_s3 + $0x8] sm:$0xff] }
   0x6   :  { %v32_v50 = vld [vmem:[%s608_s2] sm:$0xff]  ;;  %v33_v51 = vld [vmem:[%s608_s2 + $0x8] sm:$0xff]  ;;  %v34_v52 = vld [vmem:[%s608_s2 + $0x10] sm:$0xff] }
   0x7   :  { %v43_v53 = vld [vmem:[%s607_s3 + $0x18] sm:$0xff]  ;;  %v42_v55 = vld [vmem:[%s607_s3 + $0x10] sm:$0xff]  ;;  %v36_v56 = vld [vmem:[%s608_s2 + $0x20] sm:$0xff] }
   0x8   :  { %200 = vperm.xlu2 %444, %v43_v53   ;;  %v35_v54 = vld [vmem:[%s608_s2 + $0x18] sm:$0xff]  ;;  %v37_v57 = vld [vmem:[%s608_s2 + $0x28] sm:$0xff]  ;;  %v38_v58 = vld [vmem:[%s608_s2 + $0x30] sm:$0xff]  ;;  %v346_v53 = vstv %s610_s5 }
   0x9   :  { %v53_v2 = vld.sshfl [vmem:[#allocation1] sm:$0xff pattern:$0x75316420]  ;;  %v54_v3 = vld.sshfl [vmem:[#allocation1 + $0x8] sm:$0xff pattern:$0x75316420] }
   0xa   :  { %405 = vmatpush.msk.msra.mxu0 %vm80_vm0, %v53_v2  ;;  %414 = vmatpush.msk.msra.mxu1 %vm80_vm0, %v54_v3  ;;  %v39_v59 = vld [vmem:[%s608_s2 + $0x38] sm:$0xff] }
   0xb   :  { %406 = vmatmul.msk.f32.vlgmr.msra.gmra.mxu0 %vm55_vm1, %v24_v1  ;;  %415 = vmatmul.msk.f32.vlgmr.msra.gmra.mxu1 %vm55_vm1, %v24_v1 }
   0xd   :  { %205 = vperm.xlu1 %443, %v44_v28   ;;  %215 = vperm.xlu0 %442, %v46_v33  }
  0x10   :  { %195 = vperm.xlu2 %444, %v42_v55  }
  0x13   :  { %407 = vmatmul.msk.f32.gmra.mxu0 %vm55_vm1, %v25_v4  ;;  %416 = vmatmul.msk.f32.gmra.mxu1 %vm55_vm1, %v25_v4 }
  0x15   :  { %185 = vperm.xlu1 %443, %v40_v34   ;;  %190 = vperm.xlu0 %442, %v41_v43  }
  0x1b   :  { %408 = vmatmul.msk.f32.gmra.mxu0 %vm55_vm1, %v26_v5  ;;  %417 = vmatmul.msk.f32.gmra.mxu1 %vm55_vm1, %v26_v5 }
  0x23   :  { %409 = vmatmul.msk.f32.gmra.mxu0 %vm55_vm1, %v27_v6  ;;  %418 = vmatmul.msk.f32.gmra.mxu1 %vm55_vm1, %v27_v6 }
  0x2b   :  { %410 = vmatmul.msk.f32.gmra.mxu0 %vm55_vm1, %v28_v7  ;;  %419 = vmatmul.msk.f32.gmra.mxu1 %vm55_vm1, %v28_v7 }
  0x33   :  { %411 = vmatmul.msk.f32.gmra.mxu0 %vm55_vm1, %v29_v8  ;;  %420 = vmatmul.msk.f32.gmra.mxu1 %vm55_vm1, %v29_v8 }
  0x3b   :  { %412 = vmatmul.msk.f32.gmra.mxu0 %vm55_vm1, %v30_v9  ;;  %421 = vmatmul.msk.f32.gmra.mxu1 %vm55_vm1, %v30_v9 }
  0x43   :  { %413 = vmatmul.msk.f32.gmra.mxu0 %vm55_vm1, %v31_v10  ;;  %422 = vmatmul.msk.f32.gmra.mxu1 %vm55_vm1, %v31_v10 }
  0x77   :  { %v221_v8 = vpop.permute.xlu0 %220  ;;  %v211_v9 = vpop.permute.xlu1 %210 }
  0x88   :  { %v524_v11 = vpop.f32.mrf.mxu0  ;;  %v526_v12 = vpop.f32.mrf.mxu1 }
  0x89   :  { %v167_v48 = vmax.f32 %v524_v11, 0.0  ;;  %v168_v49 = vmax.f32 %v526_v12, 0.0  ;;  %v201_v12 = vpop.permute.xlu2 %200 }
  0x90   :  { %v105_v13 = vpop.f32.mrf.mxu0  ;;  %v146_v14 = vpop.f32.mrf.mxu1 }
  0x91   :  { %v169_v46 = vmax.f32 %v105_v13, 0.0  ;;  %v170_v47 = vmax.f32 %v146_v14, 0.0  ;;  %v216_v13 = vpop.permute.xlu0 %215  ;;  %v206_v14 = vpop.permute.xlu1 %205 }
  0x98   :  { %v108_v15 = vpop.f32.mrf.mxu0  ;;  %v149_v16 = vpop.f32.mrf.mxu1 }
  0x99   :  { %v171_v44 = vmax.f32 %v108_v15, 0.0  ;;  %v172_v45 = vmax.f32 %v149_v16, 0.0  ;;  %v191_v34 = vpop.permute.xlu0 %190 }
  0xa0   :  { %v111_v17 = vpop.f32.mrf.mxu0  ;;  %v152_v18 = vpop.f32.mrf.mxu1 }
  0xa1   :  { %v173_v41 = vmax.f32 %v111_v17, 0.0  ;;  %v174_v42 = vmax.f32 %v152_v18, 0.0 }
  0xa8   :  { %v114_v19 = vpop.f32.mrf.mxu0  ;;  %v155_v20 = vpop.f32.mrf.mxu1 }
  0xa9   :  { %v175_v39 = vmax.f32 %v114_v19, 0.0  ;;  %v176_v40 = vmax.f32 %v155_v20, 0.0 }
  0xb0   :  { %v117_v21 = vpop.f32.mrf.mxu0  ;;  %v158_v22 = vpop.f32.mrf.mxu1 }
  0xb1   :  { %v177_v37 = vmax.f32 %v117_v21, 0.0  ;;  %v178_v38 = vmax.f32 %v158_v22, 0.0 }
  0xb8   :  { %v120_v25 = vpop.f32.mrf.mxu0  ;;  %v161_v26 = vpop.f32.mrf.mxu1 }
  0xb9   :  { %v179_v35 = vmax.f32 %v120_v25, 0.0  ;;  %v180_v36 = vmax.f32 %v161_v26, 0.0 }
  0xc0   :  { %v123_v29 = vpop.f32.mrf.mxu0  ;;  %v164_v30 = vpop.f32.mrf.mxu1 }
  0xc1   :  { %v181_v31 = vmax.f32 %v123_v29, 0.0  ;;  %v182_v32 = vmax.f32 %v164_v30, 0.0  ;;  %v196_v29 = vpop.permute.xlu2 %195 }
  0xc3   :  { %256 = vmatpush.msra.mxu2 %v181_v31  ;;  %297 = vmatpush.msra.mxu3 %v182_v32 }
  0xc5   :  { %257 = vmatpush.msra.mxu2 %v179_v35  ;;  %298 = vmatpush.msra.mxu3 %v180_v36 }
  0xc7   :  { %258 = vmatpush.msra.mxu2 %v177_v37  ;;  %299 = vmatpush.msra.mxu3 %v178_v38 }
  0xc9   :  { %259 = vmatpush.msra.mxu2 %v175_v39  ;;  %300 = vmatpush.msra.mxu3 %v176_v40  ;;  %v186_v39 = vpop.permute.xlu1 %185 }
  0xcb   :  { %260 = vmatpush.msra.mxu2 %v173_v41  ;;  %301 = vmatpush.msra.mxu3 %v174_v42 }
  0xcd   :  { %261 = vmatpush.msra.mxu2 %v171_v44  ;;  %302 = vmatpush.msra.mxu3 %v172_v45 }
  0xcf   :  { %262 = vmatpush.msra.mxu2 %v169_v46  ;;  %303 = vmatpush.msra.mxu3 %v170_v47 }
  0xd1   :  { %263 = vmatpush.msra.mxu2 %v167_v48  ;;  %304 = vmatpush.msra.mxu3 %v168_v49 }
  0xd2   :  { %423 = vmatmul.msk.f32.vlgmr.msra.gmra.mxu2 %vm223_vm2, %v32_v50  ;;  %431 = vmatmul.msk.f32.vlgmr.msra.gmra.mxu3 %vm223_vm2, %v32_v50 }
  0xda   :  { %424 = vmatmul.msk.f32.gmra.mxu2 %vm223_vm2, %v33_v51  ;;  %432 = vmatmul.msk.f32.gmra.mxu3 %vm223_vm2, %v33_v51 }
  0xe2   :  { %425 = vmatmul.msk.f32.gmra.mxu2 %vm223_vm2, %v34_v52  ;;  %433 = vmatmul.msk.f32.gmra.mxu3 %vm223_vm2, %v34_v52  ;;  %v48_v52 = vld [vmem:[%s609_s4] sm:$0x1] }
  0xea   :  { %426 = vmatmul.msk.f32.gmra.mxu2 %vm223_vm2, %v35_v54  ;;  %434 = vmatmul.msk.f32.gmra.mxu3 %vm223_vm2, %v35_v54  ;;  %v396_v54 = vlaneseq }
  0xec   :  { %vm398_vm4 = vcmp.lt.s32.totalorder %v396_v54, 256 }
  0xf2   :  { %427 = vmatmul.msk.f32.gmra.mxu2 %vm223_vm2, %v36_v56  ;;  %435 = vmatmul.msk.f32.gmra.mxu3 %vm223_vm2, %v36_v56 }
  0xfa   :  { %428 = vmatmul.msk.f32.gmra.mxu2 %vm223_vm2, %v37_v57  ;;  %436 = vmatmul.msk.f32.gmra.mxu3 %vm223_vm2, %v37_v57 }
 0x102   :  { %429 = vmatmul.msk.f32.gmra.mxu2 %vm223_vm2, %v38_v58  ;;  %437 = vmatmul.msk.f32.gmra.mxu3 %vm223_vm2, %v38_v58 }
 0x10a   :  { %430 = vmatmul.msk.f32.gmra.mxu2 %vm223_vm2, %v39_v59  ;;  %438 = vmatmul.msk.f32.gmra.mxu3 %vm223_vm2, %v39_v59 }
 0x155   :  { %v265_v60 = vpop.f32.mrf.mxu2  ;;  %v306_v61 = vpop.f32.mrf.mxu3 }
 0x156   :  { %v266_v44 = vadd.f32 %v265_v60, %v186_v39  ;;  %v307_v45 = vadd.f32 %v306_v61, %v186_v39 }
 0x158   :  { %v330_v50 = vmax.f32 %v266_v44, 0.0  ;;  %v331_v51 = vmax.f32 %v307_v45, 0.0 }
 0x15d   :  { %v268_v62 = vpop.f32.mrf.mxu2  ;;  %v309_v63 = vpop.f32.mrf.mxu3 }
 0x15e   :  { %v269_v40 = vadd.f32 %v268_v62, %v191_v34  ;;  %v310_v41 = vadd.f32 %v309_v63, %v191_v34 }
 0x160   :  { %v332_v48 = vmax.f32 %v269_v40, 0.0  ;;  %v333_v49 = vmax.f32 %v310_v41, 0.0 }
 0x165   :  { %v271_v0 = vpop.f32.mrf.mxu2  ;;  %v312_v1 = vpop.f32.mrf.mxu3 }
 0x166   :  { %v272_v35 = vadd.f32 %v271_v0, %v196_v29  ;;  %v313_v36 = vadd.f32 %v312_v1, %v196_v29 }
 0x168   :  { %v334_v46 = vmax.f32 %v272_v35, 0.0  ;;  %v335_v47 = vmax.f32 %v313_v36, 0.0 }
 0x16d   :  { %v274_v2 = vpop.f32.mrf.mxu2  ;;  %v315_v3 = vpop.f32.mrf.mxu3 }
 0x16e   :  { %v275_v30 = vadd.f32 %v274_v2, %v201_v12  ;;  %v316_v31 = vadd.f32 %v315_v3, %v201_v12 }
 0x170   :  { %v336_v42 = vmax.f32 %v275_v30, 0.0  ;;  %v337_v43 = vmax.f32 %v316_v31, 0.0 }
 0x175   :  { %v277_v4 = vpop.f32.mrf.mxu2  ;;  %v318_v5 = vpop.f32.mrf.mxu3 }
 0x176   :  { %v278_v25 = vadd.f32 %v277_v4, %v206_v14  ;;  %v319_v26 = vadd.f32 %v318_v5, %v206_v14 }
 0x178   :  { %v338_v37 = vmax.f32 %v278_v25, 0.0  ;;  %v339_v38 = vmax.f32 %v319_v26, 0.0 }
 0x17d   :  { %v280_v6 = vpop.f32.mrf.mxu2  ;;  %v321_v7 = vpop.f32.mrf.mxu3 }
 0x17e   :  { %v281_v21 = vadd.f32 %v280_v6, %v211_v9  ;;  %v322_v22 = vadd.f32 %v321_v7, %v211_v9 }
 0x180   :  { %v340_v32 = vmax.f32 %v281_v21, 0.0  ;;  %v341_v33 = vmax.f32 %v322_v22, 0.0 }
 0x185   :  { %v283_v10 = vpop.f32.mrf.mxu2  ;;  %v324_v11 = vpop.f32.mrf.mxu3 }
 0x186   :  { %v284_v17 = vadd.f32 %v283_v10, %v216_v13  ;;  %v325_v18 = vadd.f32 %v324_v11, %v216_v13 }
 0x188   :  { %v342_v27 = vmax.f32 %v284_v17, 0.0  ;;  %v343_v28 = vmax.f32 %v325_v18, 0.0 }
 0x18d   :  { %v286_v15 = vpop.f32.mrf.mxu2  ;;  %v327_v16 = vpop.f32.mrf.mxu3 }
 0x18e   :  { %v287_v19 = vadd.f32 %v286_v15, %v221_v8  ;;  %v328_v20 = vadd.f32 %v327_v16, %v221_v8 }
 0x190   :  { %v344_v23 = vmax.f32 %v287_v19, 0.0  ;;  %v345_v24 = vmax.f32 %v328_v20, 0.0 }
 0x192   :  { %358 = vmatpush.msrb.mxu0 %v344_v23  ;;  %378 = vmatpush.msrb.mxu1 %v345_v24 }
 0x194   :  { %359 = vmatpush.msrb.mxu0 %v342_v27  ;;  %379 = vmatpush.msrb.mxu1 %v343_v28 }
 0x196   :  { %360 = vmatpush.msrb.mxu0 %v340_v32  ;;  %380 = vmatpush.msrb.mxu1 %v341_v33 }
 0x198   :  { %361 = vmatpush.msrb.mxu0 %v338_v37  ;;  %381 = vmatpush.msrb.mxu1 %v339_v38 }
 0x19a   :  { %362 = vmatpush.msrb.mxu0 %v336_v42  ;;  %382 = vmatpush.msrb.mxu1 %v337_v43 }
 0x19c   :  { %363 = vmatpush.msrb.mxu0 %v334_v46  ;;  %383 = vmatpush.msrb.mxu1 %v335_v47 }
 0x19e   :  { %364 = vmatpush.msrb.mxu0 %v332_v48  ;;  %384 = vmatpush.msrb.mxu1 %v333_v49 }
 0x1a0   :  { %365 = vmatpush.msrb.mxu0 %v330_v50  ;;  %385 = vmatpush.msrb.mxu1 %v331_v51 }
 0x1a1   :  { %440 = vmatmul.msk.f32.vlgmr.msrb.gmra.mxu1 %vm223_vm2, %v48_v52  ;;  %439 = vmatmul.msk.f32.vlgmr.msrb.gmra.mxu0 %vm223_vm2, %v48_v52 }
 0x21e   :  { %v387_v55 = vpop.f32.mrf.mxu1  ;;  %v367_v56 = vpop.f32.mrf.mxu0 }
 0x21f   :  { %v388_v57 = vadd.f32 %v387_v55, %v346_v53  ;;  %v368_v58 = vadd.f32 %v367_v56, %v346_v53 }
 0x221   :  { %v392_v59 = vrot.slane %v388_v57, 7 }
 0x223   :  { %v394_v60 = vsel %vm393_vm3, %v368_v58, %v392_v59 }
 0x224   :  { %400 = vst.msk [vmem:[%s611_s6] sm:$0x3] %vm398_vm4, %v394_v60 }

</bundles_post_ra>
